<compile_context>
chip_gen: v7x
topology: tpu7x:2x2x1
jax: 0.10.0
libtpu: 0.0.40
codegen_flags: <defaults>
</compile_context>

<pallas_src>
import functools

import jax
import jax.numpy as jnp
from jax import lax
from jax.experimental import pallas as pl
from jax.experimental.pallas import tpu as pltpu


def _round_up(v, m):
    return -(-v // m) * m


def _adain_kernel(x_ref, g_ref, b_ref, o_ref, *, eps, hw_true):
    # x_ref: (row_tile, HW_pad); g_ref/b_ref: (row_tile, 1) f32.
    x = x_ref[...].astype(jnp.float32)
    hw_pad = x.shape[-1]
    inv_n = 1.0 / float(hw_true)

    if hw_pad != hw_true:
        lane = lax.broadcasted_iota(jnp.int32, x.shape, dimension=1)
        mask = lane < hw_true
        xm = jnp.where(mask, x, 0.0)
        mu = jnp.sum(xm, axis=-1, keepdims=True) * inv_n
        xc = jnp.where(mask, x - mu, 0.0)
    else:
        mu = jnp.sum(x, axis=-1, keepdims=True) * inv_n
        xc = x - mu
    var = jnp.sum(xc * xc, axis=-1, keepdims=True) * inv_n  # biased (InstanceNorm)
    inv = lax.rsqrt(var + eps)

    g = g_ref[...]
    b = b_ref[...]
    # Fused per-row scale/shift: o = x*s + shift  ==  g*(x - mu)*inv + b
    s = g * inv
    shift = b - s * mu
    o_ref[...] = (x * s + shift).astype(o_ref.dtype)


def adaptive_instance_norm_2d(x, alpha, beta, *, eps=1e-5, row_tile=None):
    """x: (N, C, H, W); alpha, beta: (1, C, 1, 1). Returns (N, C, H, W)."""
    N, C, H, W = x.shape
    NC, HW = N * C, H * W
    HW_pad = _round_up(HW, 128)
    itemsize = jnp.dtype(x.dtype).itemsize
    sub = max(8, 32 // itemsize)  # sublane multiple: 8 for f32, 16 for bf16, ...

    if row_tile is None:
        # ~2 MiB of input per block: near the HBM-roofline plateau, small enough
        # (with in/out double buffering + f32 temporaries) for every chip's VMEM.
        target_bytes = 2 << 20
        rt = max(sub, (target_bytes // (HW_pad * itemsize)) // sub * sub)
        nc_pad = _round_up(NC, sub)
        rt = min(rt, nc_pad)  # don't pad far past the real row count
        # keep >= 2 grid steps when possible so both v7x TensorCores are fed
        if nc_pad >= 2 * sub and rt > nc_pad // 2:
            rt = _round_up(nc_pad // 2, sub)
        row_tile = int(rt)
    else:
        row_tile = int(_round_up(row_tile, sub))

    NC_pad = _round_up(NC, row_tile)
    grid = NC_pad // row_tile

    x2 = x.reshape(NC, HW)
    if NC_pad != NC or HW_pad != HW:
        x2 = jnp.pad(x2, ((0, NC_pad - NC), (0, HW_pad - HW)))

    # Per-instance affine params, kept in f32 (no low-precision round trip).
    g = jnp.broadcast_to(alpha.reshape(1, C).astype(jnp.float32), (N, C)).reshape(NC, 1)
    b = jnp.broadcast_to(beta.reshape(1, C).astype(jnp.float32), (N, C)).reshape(NC, 1)
    if NC_pad != NC:
        g = jnp.pad(g, ((0, NC_pad - NC), (0, 0)), constant_values=1.0)
        b = jnp.pad(b, ((0, NC_pad - NC), (0, 0)))

    kernel = functools.partial(_adain_kernel, eps=eps, hw_true=HW)
    out2 = pl.pallas_call(
        kernel,
        out_shape=jax.ShapeDtypeStruct((NC_pad, HW_pad), x.dtype),
        grid_spec=pltpu.PrefetchScalarGridSpec(
            num_scalar_prefetch=0,
            grid=(grid,),
            in_specs=[
                pl.BlockSpec((row_tile, HW_pad), lambda i: (i, 0)),
                pl.BlockSpec((row_tile, 1), lambda i: (i, 0)),
                pl.BlockSpec((row_tile, 1), lambda i: (i, 0)),
            ],
            out_specs=pl.BlockSpec((row_tile, HW_pad), lambda i: (i, 0)),
        ),
        compiler_params=pltpu.CompilerParams(
            dimension_semantics=("parallel",),
            vmem_limit_bytes=32 * 1024 * 1024,
        ),
    )(x2, g, b)

    return out2[:NC, :HW].reshape(N, C, H, W)


def _reference(x, alpha, beta, eps=1e-5):
    xf = x.astype(jnp.float32)
    mu = jnp.mean(xf, axis=(2, 3), keepdims=True)
    var = jnp.mean((xf - mu) ** 2, axis=(2, 3), keepdims=True)
    norm = (xf - mu) * lax.rsqrt(var + eps)
    return (alpha.astype(jnp.float32) * norm + beta.astype(jnp.float32)).astype(x.dtype)


if __name__ == "__main__":
    key = jax.random.PRNGKey(0)
    ok = True

    # Case 1: the module's natural small shape (HW multiple of 128, NC multiple of 8).
    N, C, H, W = 2, 4, 16, 16
    k0, k1, k2 = jax.random.split(key, 3)
    x = jax.random.normal(k0, (N, C, H, W), dtype=jnp.float32)
    alpha = jnp.ones((1, C, 1, 1), jnp.float32) + 0.1 * jax.random.normal(k1, (1, C, 1, 1))
    beta = jnp.zeros((1, C, 1, 1), jnp.float32) + 0.1 * jax.random.normal(k2, (1, C, 1, 1))
    out = jax.block_until_ready(adaptive_instance_norm_2d(x, alpha, beta))
    ref = _reference(x, alpha, beta)
    ok &= bool(out.shape == (N, C, H, W))
    ok &= bool(jnp.allclose(out, ref, atol=1e-4, rtol=1e-4))

    # Case 2: ragged shape (HW=196 needs lane padding+mask, NC=6 needs row padding).
    N2, C2, H2, W2 = 2, 3, 14, 14
    k3, k4, k5 = jax.random.split(k0, 3)
    x2 = jax.random.normal(k3, (N2, C2, H2, W2), dtype=jnp.float32)
    a2 = jnp.ones((1, C2, 1, 1), jnp.float32) + 0.1 * jax.random.normal(k4, (1, C2, 1, 1))
    b2 = jnp.zeros((1, C2, 1, 1), jnp.float32) + 0.1 * jax.random.normal(k5, (1, C2, 1, 1))
    out2 = jax.block_until_ready(adaptive_instance_norm_2d(x2, a2, b2))
    ref2 = _reference(x2, a2, b2)
    ok &= bool(out2.shape == (N2, C2, H2, W2))
    ok &= bool(jnp.allclose(out2, ref2, atol=1e-4, rtol=1e-4))

    assert ok
    print("KERNEL_OK")
</pallas_src>

<mosaic_0001>
module attributes {stable_mosaic.version = 11 : i64} {
  func.func @_adain_kernel(%arg0: i32, %arg1: memref<8x256xf32, #tpu.memory_space<vmem>>, %arg2: memref<8x1xf32, #tpu.memory_space<vmem>>, %arg3: memref<8x1xf32, #tpu.memory_space<vmem>>, %arg4: memref<8x256xf32, #tpu.memory_space<vmem>>) attributes {dimension_semantics = [#tpu.dimension_semantics<parallel>], iteration_bounds = array<i64: 1>, scalar_prefetch = 0 : i64, scratch_operands = 0 : i64, tpu.core_type = #tpu.core_type<tc>, window_params = [{transform_indices = @transform_0, window_bounds = array<i64: 8, 256>}, {transform_indices = @transform_1, window_bounds = array<i64: 8, 1>}, {transform_indices = @transform_2, window_bounds = array<i64: 8, 1>}, {transform_indices = @transform_3, window_bounds = array<i64: 8, 256>}]} {
    %c0 = arith.constant 0 : index
    %c0_0 = arith.constant 0 : index
    %0 = vector.load %arg1[%c0, %c0_0] : memref<8x256xf32, #tpu.memory_space<vmem>>, vector<8x256xf32>
    %cst = arith.constant dense<0.000000e+00> : vector<8xf32>
    %1 = vector.multi_reduction <add>, %0, %cst [1] : vector<8x256xf32> to vector<8xf32>
    %2 = vector.shape_cast %1 : vector<8xf32> to vector<8x1xf32>
    %cst_1 = arith.constant 3.906250e-03 : f32
    %3 = vector.broadcast %cst_1 : f32 to vector<8x1xf32>
    %4 = arith.mulf %2, %3 : vector<8x1xf32>
    %5 = vector.broadcast %4 : vector<8x1xf32> to vector<8x256xf32>
    %6 = arith.subf %0, %5 : vector<8x256xf32>
    %7 = arith.mulf %6, %6 : vector<8x256xf32>
    %cst_2 = arith.constant dense<0.000000e+00> : vector<8xf32>
    %8 = vector.multi_reduction <add>, %7, %cst_2 [1] : vector<8x256xf32> to vector<8xf32>
    %9 = vector.shape_cast %8 : vector<8xf32> to vector<8x1xf32>
    %cst_3 = arith.constant 3.906250e-03 : f32
    %10 = vector.broadcast %cst_3 : f32 to vector<8x1xf32>
    %11 = arith.mulf %9, %10 : vector<8x1xf32>
    %cst_4 = arith.constant 9.99999974E-6 : f32
    %12 = vector.broadcast %cst_4 : f32 to vector<8x1xf32>
    %13 = arith.addf %11, %12 : vector<8x1xf32>
    %14 = math.rsqrt %13 : vector<8x1xf32>
    %c0_5 = arith.constant 0 : index
    %c0_6 = arith.constant 0 : index
    %15 = vector.load %arg2[%c0_5, %c0_6] : memref<8x1xf32, #tpu.memory_space<vmem>>, vector<8x1xf32>
    %c0_7 = arith.constant 0 : index
    %c0_8 = arith.constant 0 : index
    %16 = vector.load %arg3[%c0_7, %c0_8] : memref<8x1xf32, #tpu.memory_space<vmem>>, vector<8x1xf32>
    %17 = arith.mulf %15, %14 : vector<8x1xf32>
    %18 = arith.mulf %17, %4 : vector<8x1xf32>
    %19 = arith.subf %16, %18 : vector<8x1xf32>
    %20 = vector.broadcast %17 : vector<8x1xf32> to vector<8x256xf32>
    %21 = arith.mulf %0, %20 : vector<8x256xf32>
    %22 = vector.broadcast %19 : vector<8x1xf32> to vector<8x256xf32>
    %23 = arith.addf %21, %22 : vector<8x256xf32>
    %c0_9 = arith.constant 0 : index
    %c0_10 = arith.constant 0 : index
    %24 = vector.load %arg4[%c0_9, %c0_10] : memref<8x256xf32, #tpu.memory_space<vmem>>, vector<8x256xf32>
    tpu.vector_store %arg4[%c0_9, %c0_10], %23 {strides = array<i32>} : memref<8x256xf32, #tpu.memory_space<vmem>>, vector<8x256xf32>,
    return
  }
  func.func @transform_0(%arg0: i32) -> (i32, i32) {
    %c0_i32 = arith.constant 0 : i32
    %c0_i32_0 = arith.constant 0 : i32
    return %arg0, %c0_i32 : i32, i32
  }
  func.func @transform_1(%arg0: i32) -> (i32, i32) {
    %c0_i32 = arith.constant 0 : i32
    %c0_i32_0 = arith.constant 0 : i32
    return %arg0, %c0_i32 : i32, i32
  }
  func.func @transform_2(%arg0: i32) -> (i32, i32) {
    %c0_i32 = arith.constant 0 : i32
    %c0_i32_0 = arith.constant 0 : i32
    return %arg0, %c0_i32 : i32, i32
  }
  func.func @transform_3(%arg0: i32) -> (i32, i32) {
    %c0_i32 = arith.constant 0 : i32
    %c0_i32_0 = arith.constant 0 : i32
    return %arg0, %c0_i32 : i32, i32
  }
}

</mosaic_0001>

<bundles_post_ra>
// kernel: tpu_custom_call.1
= control target key start
LH: loop header
LB: loop body
LE: loop exit
PB: predicated region body
PF: predicated region fallthrough
CT: control target
= control target key end

     0   :  { %s142_s0 = inlined_call_operand.vmem [shape: f32[8,256], index: 0, kind: input, shape index: {}]   ;;  %s143_s1 = inlined_call_operand.vmem [shape: f32[8,1], index: 1, kind: input, shape index: {}]   ;;  %s144_s2 = inlined_call_operand.vmem [shape: f32[8,1], index: 2, kind: input, shape index: {}]   ;;  %s145_s3 = inlined_call_operand.hbm [shape: f32[8,256], index: 3, kind: output, shape index: {}]  }
   0x1   :  { %v15_v0 = vld [vmem:[%s142_s0] sm:$0xff]  ;;  %v16_v1 = vld [vmem:[%s142_s0 + $0x8] sm:$0xff] }
   0x2   :  { %8 = vsyncpa [#allocation3], 0  ;;  %v17_v2 = vadd.f32 %v16_v1, %v15_v0  ;;  %v96_v10 = vmov 0   ;;  %v31_v14 = vld [vmem:[%s143_s1] sm:$0xff]  ;;  %s97_s19 = smov [#allocation2]  }
   0x3   :  { %68 = vset.pattern.permute.xlu1 %v96_v10  ;;  %69 = vset.pattern.permute.xlu0 %v96_v10  ;;  %v32_v17 = vld [vmem:[%s144_s2] sm:$0xff]  ;;  %s58_s20 = sshll.u32 %s97_s19, 4  ;;  %s59_s20 = int_to_ptr.vmem [resolvable:$true] %s58_s20 }
   0x4   :  { %18 = vadd.xlane.f32.xlu0 %v17_v2  ;;  %s72_s1 = scalar_lea.vmem %s59_s20, 256  ;;  %p77_p1 = scmp.lt.s32.totalorder %s59_s20, %s59_s20 }
   0x5   :  { %p73_p0 = scmp.ne.s32.totalorder %s59_s20, %s72_s1  ;;  %p78_p2 = scmp.lt.s32.totalorder %s72_s1, %s72_s1 }
   0x7   :  { %p79_p3 = por %p78_p2, %p77_p1 }
   0x9   :  { %p80_p4 = pnand %p79_p3, %p73_p0 }
  0x91   :  { %v19_v3 = vpop.xlane.xlu0 %18 }
  0x92   :  { %v20_v4 = vmul.f32 0.00390625, %v19_v3 }
  0x94   :  { %v21_v5 = vsub.f32 %v15_v0, %v20_v4  ;;  %v22_v6 = vsub.f32 %v16_v1, %v20_v4 }
  0x96   :  { %v23_v7 = vmul.f32 %v21_v5, %v21_v5  ;;  %v24_v8 = vmul.f32 %v22_v6, %v22_v6 }
  0x98   :  { %v25_v9 = vadd.f32 %v24_v8, %v23_v7 }
  0x9a   :  { %26 = vadd.xlane.f32.xlu0 %v25_v9 }
 0x127   :  { %v27_v11 = vpop.xlane.xlu0 %26 }
 0x128   :  { %v28_v12 = vmul.f32 0.00390625, %v27_v11 }
 0x12a   :  { %v29_v13 = vadd.f32 1e-05, %v28_v12 }
 0x12c   :  { %70 = vrsqrt.f32 %v29_v13 }
 0x136   :  { %v71_v15 = vpop.eup %70 }
 0x137   :  { %v33_v16 = vmul.f32 %v71_v15, %v31_v14 }
 0x139   :  { %38 = vperm.xlu1 %68, %v33_v16   ;;  %v34_v18 = vmul.f32 %v33_v16, %v20_v4 }
 0x13b   :  { %v35_v19 = vsub.f32 %v32_v17, %v34_v18 }
 0x13d   :  { %45 = vperm.xlu1 %68, %v35_v19  }
 0x1b8   :  { %v39_v20 = vpop.permute.xlu1 %38 }
 0x1b9   :  { %v41_v21 = vmul.f32 %v39_v20, %v15_v0  ;;  %v42_v22 = vmul.f32 %v39_v20, %v16_v1 }
 0x1bc   :  { %v46_v23 = vpop.permute.xlu1 %45 }
 0x1bd   :  { %v48_v24 = vadd.f32 %v46_v23, %v41_v21  ;;  %v49_v25 = vadd.f32 %v46_v23, %v42_v22 }
 0x1bf   :  { %50 = vst [vmem:[#allocation2] sm:$0xff] %v48_v24  ;;  %51 = vst [vmem:[#allocation2 + $0x8] sm:$0xff] %v49_v25 }
 0x1c0   :  { %83 = shalt.err (!%p80_p4)
}
 0x1c1   :  { %s84_s22 = scalar_lea.hbm %s145_s3, 256 }
 0x1c2   :  { %p85_p5 = scmp.ne.s32.totalorder %s145_s3, %s84_s22  ;;  %p88_p6 = scmp.lt.u32.totalorder %s84_s22, %s145_s3 }
 0x1c4   :  { %p90_p7 = pnand %p88_p6, %p85_p5 }
 0x1c6   :  { %93 = shalt.err (!%p90_p7)
}
 0x1c7   :  { %61 = dma.vmem_to_hbm [thread:$0]  %s59_s20, 256, %s145_s3, [#allocation3]  }
 0x1c8   :  { %94 = dma.done.wait [#allocation3], 256  }
 0x1c9   :  { %95 = vsyncadd [#allocation3], 4294967040 }
 0x1ca   :  { %65 = vsyncpa [#allocation3], 1 }

</bundles_post_ra>
